<compile_context>
chip_gen: v5e
topology: v5e:2x2
jax: 0.10.0
libtpu: 0.0.40
codegen_flags: <defaults>
</compile_context>

<pallas_src>
import functools

import jax
import jax.numpy as jnp
from jax.experimental import pallas as pl
from jax.experimental.pallas import tpu as pltpu


def _vmem_capacity_bytes() -> int:
    """Physical VMEM of the local TPU generation (fallback: v7x's 64 MiB)."""
    try:
        info = pltpu.get_tpu_info()
        cap = getattr(info, "vmem_capacity_bytes", None)
        if cap:
            return int(cap)
    except Exception:
        pass
    return 64 << 20


def _pick_seq_tile(seq_len, c_in, c_out, itemsize, vmem_bytes, align, forced=None):
    """Largest sequence tile (multiple of `align`) whose per-step working set
    (x/out double-buffered + f32 tap products + shifted-slice temporaries)
    fits in roughly a third of physical VMEM."""
    per_pos = (3 * c_in * itemsize          # x tile (2x buffered) + masked copy
               + 2 * c_out * itemsize       # output tile (2x buffered)
               + 7 * 4 * c_out)             # f32 tap products + shifted slices + acc
    budget = max(vmem_bytes // 3, 4 << 20)
    tl = min(budget // max(per_pos, 1), 2048)
    if forced is not None:
        tl = min(tl, int(forced))
    if tl >= seq_len:
        return int(seq_len), 1
    tl = max(align, (int(tl) // align) * align)
    return int(tl), int(pl.cdiv(seq_len, tl))


def _conv1d_k3_cl_kernel(x_ref, prev_ref, next_ref, w_ref, b_ref, o_ref, p_ref, *,
                         seq_len, mask_rows, precision):
    """Channels-last tile: rows = sequence positions, lanes = Cout.

    x_ref:    (1, TL, Cin)       current sequence tile (input dtype)
    prev_ref: (1, 1, 1, Cin)     row just before the tile (zero at sequence start)
    next_ref: (1, 1, 1, Cin)     row just after the tile (zero at sequence end)
    w_ref:    (Cin, 3*Cout)      column block k holds tap k (resident)
    b_ref:    (1, Cout)          f32 bias (resident)
    o_ref:    (1, TL, Cout)
    p_ref:    (TL+2, 3*Cout)     f32 scratch holding the padded tap products
    """
    tl, c_out = o_ref.shape[1], o_ref.shape[2]
    xc = x_ref[0]                                           # (TL, Cin)
    if mask_rows:
        # Zero rows past the true end of the sequence (padded final tile).
        row = jax.lax.broadcasted_iota(jnp.int32, (tl, 1), 0) + pl.program_id(1) * tl
        xc = jnp.where(row < seq_len, xc, jnp.zeros_like(xc))

    w = w_ref[...]
    p_ref[0:1, :] = jnp.dot(prev_ref[0, 0], w,
                            preferred_element_type=jnp.float32, precision=precision)
    p_ref[1:tl + 1, :] = jnp.dot(xc, w,
                                 preferred_element_type=jnp.float32, precision=precision)
    p_ref[tl + 1:tl + 2, :] = jnp.dot(next_ref[0, 0], w,
                                      preferred_element_type=jnp.float32, precision=precision)

    # y[t] = x[t-1] @ W0 + x[t] @ W1 + x[t+1] @ W2 + b  (zero halo fused above)
    y = (p_ref[0:tl, 0:c_out]
         + p_ref[1:tl + 1, c_out:2 * c_out]
         + p_ref[2:tl + 2, 2 * c_out:3 * c_out]
         + b_ref[...])
    o_ref[0] = y.astype(o_ref.dtype)


def _conv1d_k3_cf_kernel(x_ref, prev_ref, next_ref, w_ref, b_ref, o_ref, p_ref, *,
                         seq_len, mask_cols, precision):
    """Channels-first tile: rows = Cout, lanes = sequence positions (lane-dense).

    x_ref:    (1, Cin, TL)
    prev_ref: (1, 1, Cin, 1)
    next_ref: (1, 1, Cin, 1)
    w_ref:    (3*Cout, Cin)      row block k holds tap k (resident)
    b_ref:    (Cout, 1)          f32 bias
    o_ref:    (1, Cout, TL)
    p_ref:    (3*Cout, TL+2)     f32 scratch
    """
    c_out, tl = o_ref.shape[1], o_ref.shape[2]
    xc = x_ref[0]                                           # (Cin, TL)
    if mask_cols:
        col = jax.lax.broadcasted_iota(jnp.int32, (1, tl), 1) + pl.program_id(1) * tl
        xc = jnp.where(col < seq_len, xc, jnp.zeros_like(xc))

    w = w_ref[...]
    p_ref[:, 0:1] = jnp.dot(w, prev_ref[0, 0],
                            preferred_element_type=jnp.float32, precision=precision)
    p_ref[:, 1:tl + 1] = jnp.dot(w, xc,
                                 preferred_element_type=jnp.float32, precision=precision)
    p_ref[:, tl + 1:tl + 2] = jnp.dot(w, next_ref[0, 0],
                                      preferred_element_type=jnp.float32, precision=precision)

    y = (p_ref[0:c_out, 0:tl]
         + p_ref[c_out:2 * c_out, 1:tl + 1]
         + p_ref[2 * c_out:3 * c_out, 2:tl + 2]
         + b_ref[...])
    o_ref[0] = y.astype(o_ref.dtype)


def conv_encoder_forward(x, weight, bias, *, seq_last=False, precision=None,
                         max_seq_tile=None):
    """Pallas forward of convEncoder (Conv1d(Cin, Cout, k=3, pad=1) over the seq axis).

    x:      (B, L, Cin) if seq_last=False, else (B, Cin, L)   (f32 or bf16)
    weight: (Cout, Cin, 3)   PyTorch Conv1d layout
    bias:   (Cout,)
    Returns (B, L, Cout) if seq_last=False, else (B, Cout, L), in x.dtype;
    the convolution accumulates in f32 on the MXU.
    """
    c_out, c_in, ksz = weight.shape
    assert ksz == 3, "convEncoder uses kernel_size=3"
    act_dtype = x.dtype
    itemsize = jnp.dtype(act_dtype).itemsize

    if seq_last:
        B, x_cin, L = x.shape
    else:
        B, L, x_cin = x.shape
    assert x_cin == c_in, f"channel mismatch: {x_cin} vs {c_in}"

    vmem_bytes = _vmem_capacity_bytes()
    align = 128 if seq_last else 8          # seq axis on lanes (cf) vs sublanes (cl)
    tl, nt = _pick_seq_tile(L, c_in, c_out, itemsize, vmem_bytes, align, max_seq_tile)
    needs_mask = (nt * tl) != L             # padded (partial) final tile

    b_f32 = bias.astype(jnp.float32)

    if seq_last:
        # ---- channels-first path: (B, Cin, L) -> (B, Cout, L), no wrapper transposes
        if nt > 1:
            prev_core = x[:, :, tl - 1:(nt - 1) * tl:tl]          # (B, Cin, nt-1)
            next_core = x[:, :, tl:(nt - 1) * tl + 1:tl]          # (B, Cin, nt-1)
            zc = jnp.zeros((B, c_in, 1), act_dtype)
            prev_arr = jnp.swapaxes(jnp.concatenate([zc, prev_core], axis=2), 1, 2)[..., None]
            next_arr = jnp.swapaxes(jnp.concatenate([next_core, zc], axis=2), 1, 2)[..., None]
        else:
            prev_arr = jnp.zeros((B, 1, c_in, 1), act_dtype)
            next_arr = jnp.zeros((B, 1, c_in, 1), act_dtype)

        # (Cout, Cin, 3) -> (3*Cout, Cin): row block k holds tap k.
        w_all = jnp.transpose(weight, (2, 0, 1)).reshape(3 * c_out, c_in).astype(act_dtype)
        b_k = b_f32.reshape(c_out, 1)

        kernel = functools.partial(_conv1d_k3_cf_kernel, seq_len=L,
                                   mask_cols=needs_mask, precision=precision)
        in_specs = [
            pl.BlockSpec((1, c_in, tl), lambda b, j: (b, 0, j)),
            pl.BlockSpec((1, 1, c_in, 1), lambda b, j: (b, j, 0, 0)),
            pl.BlockSpec((1, 1, c_in, 1), lambda b, j: (b, j, 0, 0)),
            pl.BlockSpec((3 * c_out, c_in), lambda b, j: (0, 0)),
            pl.BlockSpec((c_out, 1), lambda b, j: (0, 0)),
        ]
        out_spec = pl.BlockSpec((1, c_out, tl), lambda b, j: (b, 0, j))
        out_shape = jax.ShapeDtypeStruct((B, c_out, L), act_dtype)
        scratch = [pltpu.VMEM((3 * c_out, tl + 2), jnp.float32)]
    else:
        # ---- channels-last path: (B, L, Cin) -> (B, L, Cout)
        if nt > 1:
            prev_core = x[:, tl - 1:(nt - 1) * tl:tl, :]          # (B, nt-1, Cin)
            next_core = x[:, tl:(nt - 1) * tl + 1:tl, :]          # (B, nt-1, Cin)
            zr = jnp.zeros((B, 1, c_in), act_dtype)
            prev_arr = jnp.concatenate([zr, prev_core], axis=1)[:, :, None, :]
            next_arr = jnp.concatenate([next_core, zr], axis=1)[:, :, None, :]
        else:
            prev_arr = jnp.zeros((B, 1, 1, c_in), act_dtype)
            next_arr = jnp.zeros((B, 1, 1, c_in), act_dtype)

        # (Cout, Cin, 3) -> (Cin, 3*Cout): column block k holds tap k (x @ W form).
        w_all = jnp.transpose(weight, (1, 2, 0)).reshape(c_in, 3 * c_out).astype(act_dtype)
        b_k = b_f32.reshape(1, c_out)

        kernel = functools.partial(_conv1d_k3_cl_kernel, seq_len=L,
                                   mask_rows=needs_mask, precision=precision)
        in_specs = [
            pl.BlockSpec((1, tl, c_in), lambda b, j: (b, j, 0)),
            pl.BlockSpec((1, 1, 1, c_in), lambda b, j: (b, j, 0, 0)),
            pl.BlockSpec((1, 1, 1, c_in), lambda b, j: (b, j, 0, 0)),
            pl.BlockSpec((c_in, 3 * c_out), lambda b, j: (0, 0)),
            pl.BlockSpec((1, c_out), lambda b, j: (0, 0)),
        ]
        out_spec = pl.BlockSpec((1, tl, c_out), lambda b, j: (b, j, 0))
        out_shape = jax.ShapeDtypeStruct((B, L, c_out), act_dtype)
        scratch = [pltpu.VMEM((tl + 2, 3 * c_out), jnp.float32)]

    # Scoped-VMEM budget derived from the actual per-step working set and the
    # physical VMEM of this generation (64 MiB on v7x, 128 MiB on v5e/v6e).
    est = (2 * tl * c_in * itemsize + 2 * tl * c_out * itemsize
           + tl * c_in * itemsize
           + (tl + 2) * 3 * c_out * 4 + 4 * tl * c_out * 4
           + 3 * c_in * c_out * itemsize + c_out * 4)
    vmem_limit = int(min(int(0.75 * vmem_bytes), max(16 << 20, 2 * est + (2 << 20))))

    cost = pl.CostEstimate(
        flops=int(2 * B * nt * (tl + 2) * 3 * c_in * c_out),
        transcendentals=0,
        bytes_accessed=int(x.size * itemsize
                           + 3 * c_in * c_out * itemsize + c_out * 4
                           + B * L * c_out * itemsize
                           + 2 * B * nt * c_in * itemsize),
    )

    return pl.pallas_call(
        kernel,
        out_shape=out_shape,
        grid_spec=pltpu.PrefetchScalarGridSpec(
            num_scalar_prefetch=0,
            grid=(B, nt),
            in_specs=in_specs,
            out_specs=out_spec,
            scratch_shapes=scratch,
        ),
        compiler_params=pltpu.CompilerParams(
            dimension_semantics=("parallel", "parallel"),
            vmem_limit_bytes=vmem_limit),
        cost_estimate=cost,
    )(x, prev_arr, next_arr, w_all, b_k)


def _reference_forward(x, weight, bias, seq_last=False, precision=None):
    """Pure-JAX (f32) reference of the PyTorch forward (cross-correlation, pad=1)."""
    x_cl = jnp.swapaxes(x, -2, -1) if seq_last else x
    x_cl = x_cl.astype(jnp.float32)
    _, L, _ = x_cl.shape
    x_pad = jnp.pad(x_cl, ((0, 0), (1, 1), (0, 0)))
    wk = jnp.transpose(weight, (2, 1, 0)).astype(jnp.float32)   # (3, Cin, Cout)
    y = (jnp.einsum("blc,co->blo", x_pad[:, 0:L], wk[0], precision=precision)
         + jnp.einsum("blc,co->blo", x_pad[:, 1:L + 1], wk[1], precision=precision)
         + jnp.einsum("blc,co->blo", x_pad[:, 2:L + 2], wk[2], precision=precision)
         + bias.astype(jnp.float32))
    if seq_last:
        y = jnp.swapaxes(y, -2, -1)
    return y


if __name__ == "__main__":
    B, L, C_IN, C_OUT = 2, 16, 8, 32
    hi = jax.lax.Precision.HIGHEST

    key = jax.random.PRNGKey(0)
    kx, kw, kb = jax.random.split(key, 3)
    x = jax.random.normal(kx, (B, L, C_IN), jnp.float32)
    weight = jax.random.normal(kw, (C_OUT, C_IN, 3), jnp.float32) * (1.0 / (3 * C_IN) ** 0.5)
    bias = jax.random.normal(kb, (C_OUT,), jnp.float32) * 0.1

    # --- seqLast=False (module default), f32 ---
    y = jax.block_until_ready(conv_encoder_forward(x, weight, bias, seq_last=False, precision=hi))
    ref = _reference_forward(x, weight, bias, seq_last=False, precision=hi)
    assert y.shape == (B, L, C_OUT), f"unexpected output shape {y.shape}"
    assert jnp.allclose(y, ref, atol=1e-4, rtol=1e-4), "mismatch vs reference (seqLast=False)"

    # Independent cross-check against XLA's conv (same semantics as torch Conv1d).
    lhs = jnp.swapaxes(x, -2, -1)
    xla_out = jax.lax.conv_general_dilated(
        lhs, weight, window_strides=(1,), padding=((1, 1),),
        dimension_numbers=("NCH", "OIH", "NCH"), precision=hi) + bias[None, :, None]
    assert jnp.allclose(y, jnp.swapaxes(xla_out, -2, -1), atol=1e-4, rtol=1e-4), \
        "mismatch vs lax.conv reference"

    # --- seqLast=True: channels-first kernel, no wrapper transposes ---
    x_sl = jnp.swapaxes(x, -2, -1)                              # (B, Cin, L)
    y_sl = jax.block_until_ready(conv_encoder_forward(x_sl, weight, bias, seq_last=True, precision=hi))
    ref_sl = _reference_forward(x_sl, weight, bias, seq_last=True, precision=hi)
    assert y_sl.shape == (B, C_OUT, L), f"unexpected output shape {y_sl.shape}"
    assert jnp.allclose(y_sl, ref_sl, atol=1e-4, rtol=1e-4), "mismatch vs reference (seqLast=True)"

    # --- bf16 activations end-to-end (halved DMA), f32 accumulation ---
    y_bf = jax.block_until_ready(conv_encoder_forward(x.astype(jnp.bfloat16), weight, bias))
    assert y_bf.dtype == jnp.bfloat16
    assert jnp.allclose(y_bf.astype(jnp.float32), ref, atol=6e-2, rtol=6e-2), \
        "mismatch vs reference (bf16 activations)"

    # --- tiled channels-last path: halo rows + partial (masked) final tile ---
    L2 = 44
    x2 = jax.random.normal(kx, (B, L2, C_IN), jnp.float32)
    y2 = jax.block_until_ready(conv_encoder_forward(x2, weight, bias, seq_last=False,
                                                    precision=hi, max_seq_tile=16))
    ref2 = _reference_forward(x2, weight, bias, seq_last=False, precision=hi)
    assert jnp.allclose(y2, ref2, atol=1e-4, rtol=1e-4), "mismatch in tiled channels-last path"

    # --- tiled channels-first path: halo cols + partial (masked) final tile ---
    L3 = 200
    x3 = jax.random.normal(kb, (B, C_IN, L3), jnp.float32)
    y3 = jax.block_until_ready(conv_encoder_forward(x3, weight, bias, seq_last=True,
                                                    precision=hi, max_seq_tile=128))
    ref3 = _reference_forward(x3, weight, bias, seq_last=True, precision=hi)
    assert jnp.allclose(y3, ref3, atol=1e-4, rtol=1e-4), "mismatch in tiled channels-first path"

    print("KERNEL_OK")
</pallas_src>

<mosaic_0001>
module attributes {stable_mosaic.version = 11 : i64} {
  func.func @_conv1d_k3_cl_kernel(%arg0: i32, %arg1: i32, %arg2: memref<1x16x8xf32, #tpu.memory_space<vmem>>, %arg3: memref<1x1x1x8xf32, #tpu.memory_space<vmem>>, %arg4: memref<1x1x1x8xf32, #tpu.memory_space<vmem>>, %arg5: memref<8x96xf32, #tpu.memory_space<vmem>>, %arg6: memref<1x32xf32, #tpu.memory_space<vmem>>, %arg7: memref<1x16x32xf32, #tpu.memory_space<vmem>>, %arg8: memref<18x96xf32, #tpu.memory_space<vmem>>) attributes {dimension_semantics = [#tpu.dimension_semantics<parallel>, #tpu.dimension_semantics<parallel>], iteration_bounds = array<i64: 2, 1>, scalar_prefetch = 0 : i64, scratch_operands = 1 : i64, tpu.core_type = #tpu.core_type<tc>, window_params = [{transform_indices = @transform_0, window_bounds = array<i64: 1, 16, 8>}, {transform_indices = @transform_1, window_bounds = array<i64: 1, 1, 1, 8>}, {transform_indices = @transform_2, window_bounds = array<i64: 1, 1, 1, 8>}, {pipeline_mode = #tpu.pipeline_mode<synchronous>, transform_indices = @transform_3, window_bounds = array<i64: 8, 96>}, {pipeline_mode = #tpu.pipeline_mode<synchronous>, transform_indices = @transform_4, window_bounds = array<i64: 1, 32>}, {transform_indices = @transform_5, window_bounds = array<i64: 1, 16, 32>}]} {
    %c0 = arith.constant 0 : index
    %c0_0 = arith.constant 0 : index
    %c0_1 = arith.constant 0 : index
    %0 = vector.load %arg2[%c0, %c0_0, %c0_1] : memref<1x16x8xf32, #tpu.memory_space<vmem>>, vector<1x16x8xf32>
    %1 = vector.shape_cast %0 : vector<1x16x8xf32> to vector<16x8xf32>
    %c0_2 = arith.constant 0 : index
    %c0_3 = arith.constant 0 : index
    %2 = vector.load %arg5[%c0_2, %c0_3] : memref<8x96xf32, #tpu.memory_space<vmem>>, vector<8x96xf32>
    %c0_4 = arith.constant 0 : index
    %c0_5 = arith.constant 0 : index
    %c0_6 = arith.constant 0 : index
    %c0_7 = arith.constant 0 : index
    %3 = vector.load %arg3[%c0_4, %c0_5, %c0_6, %c0_7] : memref<1x1x1x8xf32, #tpu.memory_space<vmem>>, vector<1x1x1x8xf32>
    %4 = vector.shape_cast %3 : vector<1x1x1x8xf32> to vector<1x8xf32>
    %cst = arith.constant dense<0.000000e+00> : vector<1x96xf32>
    %5 = tpu.matmul %4, %2, %cst {dimension_numbers = #tpu.dot_dimension_numbers<[1], [0], [0], [1], [0, 0, 1, 1], [], []>, precision = #tpu.contract_precision<fp32>} : vector<1x8xf32>, vector<8x96xf32>, vector<1x96xf32> -> vector<1x96xf32>
    %c0_8 = arith.constant 0 : index
    %c0_9 = arith.constant 0 : index
    %6 = vector.load %arg8[%c0_8, %c0_9] : memref<18x96xf32, #tpu.memory_space<vmem>>, vector<1x96xf32>
    tpu.vector_store %arg8[%c0_8, %c0_9], %5 {strides = array<i32>} : memref<18x96xf32, #tpu.memory_space<vmem>>, vector<1x96xf32>,
    %cst_10 = arith.constant dense<0.000000e+00> : vector<16x96xf32>
    %7 = tpu.matmul %1, %2, %cst_10 {dimension_numbers = #tpu.dot_dimension_numbers<[1], [0], [0], [1], [0, 0, 1, 1], [], []>, precision = #tpu.contract_precision<fp32>} : vector<16x8xf32>, vector<8x96xf32>, vector<16x96xf32> -> vector<16x96xf32>
    %c1 = arith.constant 1 : index
    %c0_11 = arith.constant 0 : index
    %8 = vector.load %arg8[%c1, %c0_11] : memref<18x96xf32, #tpu.memory_space<vmem>>, vector<16x96xf32>
    tpu.vector_store %arg8[%c1, %c0_11], %7 {strides = array<i32>} : memref<18x96xf32, #tpu.memory_space<vmem>>, vector<16x96xf32>,
    %c0_12 = arith.constant 0 : index
    %c0_13 = arith.constant 0 : index
    %c0_14 = arith.constant 0 : index
    %c0_15 = arith.constant 0 : index
    %9 = vector.load %arg4[%c0_12, %c0_13, %c0_14, %c0_15] : memref<1x1x1x8xf32, #tpu.memory_space<vmem>>, vector<1x1x1x8xf32>
    %10 = vector.shape_cast %9 : vector<1x1x1x8xf32> to vector<1x8xf32>
    %cst_16 = arith.constant dense<0.000000e+00> : vector<1x96xf32>
    %11 = tpu.matmul %10, %2, %cst_16 {dimension_numbers = #tpu.dot_dimension_numbers<[1], [0], [0], [1], [0, 0, 1, 1], [], []>, precision = #tpu.contract_precision<fp32>} : vector<1x8xf32>, vector<8x96xf32>, vector<1x96xf32> -> vector<1x96xf32>
    %c17 = arith.constant 17 : index
    %c0_17 = arith.constant 0 : index
    %12 = vector.load %arg8[%c17, %c0_17] : memref<18x96xf32, #tpu.memory_space<vmem>>, vector<1x96xf32>
    tpu.vector_store %arg8[%c17, %c0_17], %11 {strides = array<i32>} : memref<18x96xf32, #tpu.memory_space<vmem>>, vector<1x96xf32>,
    %c0_18 = arith.constant 0 : index
    %c0_19 = arith.constant 0 : index
    %13 = vector.load %arg8[%c0_18, %c0_19] : memref<18x96xf32, #tpu.memory_space<vmem>>, vector<16x32xf32>
    %c1_20 = arith.constant 1 : index
    %c32 = arith.constant 32 : index
    %14 = vector.load %arg8[%c1_20, %c32] : memref<18x96xf32, #tpu.memory_space<vmem>>, vector<16x32xf32>
    %15 = arith.addf %13, %14 : vector<16x32xf32>
    %c2 = arith.constant 2 : index
    %c64 = arith.constant 64 : index
    %16 = vector.load %arg8[%c2, %c64] : memref<18x96xf32, #tpu.memory_space<vmem>>, vector<16x32xf32>
    %17 = arith.addf %15, %16 : vector<16x32xf32>
    %c0_21 = arith.constant 0 : index
    %c0_22 = arith.constant 0 : index
    %18 = vector.load %arg6[%c0_21, %c0_22] : memref<1x32xf32, #tpu.memory_space<vmem>>, vector<1x32xf32>
    %19 = vector.broadcast %18 : vector<1x32xf32> to vector<16x32xf32>
    %20 = arith.addf %17, %19 : vector<16x32xf32>
    %c0_23 = arith.constant 0 : index
    %c0_24 = arith.constant 0 : index
    %c0_25 = arith.constant 0 : index
    %21 = vector.load %arg7[%c0_23, %c0_24, %c0_25] : memref<1x16x32xf32, #tpu.memory_space<vmem>>, vector<1x16x32xf32>
    %22 = vector.shape_cast %21 : vector<1x16x32xf32> to vector<16x32xf32>
    %23 = vector.shape_cast %20 : vector<16x32xf32> to vector<1x16x32xf32>
    tpu.vector_store %arg7[%c0_23, %c0_24, %c0_25], %23 {strides = array<i32>} : memref<1x16x32xf32, #tpu.memory_space<vmem>>, vector<1x16x32xf32>,
    return
  }
  func.func @transform_0(%arg0: i32, %arg1: i32) -> (i32, i32, i32) {
    %c0_i32 = arith.constant 0 : i32
    %c0_i32_0 = arith.constant 0 : i32
    return %arg0, %arg1, %c0_i32 : i32, i32, i32
  }
  func.func @transform_1(%arg0: i32, %arg1: i32) -> (i32, i32, i32, i32) {
    %c0_i32 = arith.constant 0 : i32
    %c0_i32_0 = arith.constant 0 : i32
    %c0_i32_1 = arith.constant 0 : i32
    return %arg0, %arg1, %c0_i32, %c0_i32_0 : i32, i32, i32, i32
  }
  func.func @transform_2(%arg0: i32, %arg1: i32) -> (i32, i32, i32, i32) {
    %c0_i32 = arith.constant 0 : i32
    %c0_i32_0 = arith.constant 0 : i32
    %c0_i32_1 = arith.constant 0 : i32
    return %arg0, %arg1, %c0_i32, %c0_i32_0 : i32, i32, i32, i32
  }
  func.func @transform_3(%arg0: i32, %arg1: i32) -> (i32, i32) {
    %c0_i32 = arith.constant 0 : i32
    %c0_i32_0 = arith.constant 0 : i32
    %c0_i32_1 = arith.constant 0 : i32
    return %c0_i32, %c0_i32_0 : i32, i32
  }
  func.func @transform_4(%arg0: i32, %arg1: i32) -> (i32, i32) {
    %c0_i32 = arith.constant 0 : i32
    %c0_i32_0 = arith.constant 0 : i32
    %c0_i32_1 = arith.constant 0 : i32
    return %c0_i32, %c0_i32_0 : i32, i32
  }
  func.func @transform_5(%arg0: i32, %arg1: i32) -> (i32, i32, i32) {
    %c0_i32 = arith.constant 0 : i32
    %c0_i32_0 = arith.constant 0 : i32
    return %arg0, %arg1, %c0_i32 : i32, i32, i32
  }
}

</mosaic_0001>

<bundles_post_ra>
// kernel: tpu_custom_call.1
= control target key start
LH: loop header
LB: loop body
LE: loop exit
PB: predicated region body
PF: predicated region fallthrough
CT: control target
= control target key end

     0   :  { %10 = vsyncpa [#allocation4], 0  ;;  %s1271_s0 = inlined_call_operand.vmem [shape: f32[2,16,8], index: 0, kind: input, shape index: {}]   ;;  %s1272_s1 = inlined_call_operand.vmem [shape: f32[2,1,1,8], index: 1, kind: input, shape index: {}]   ;;  %s1273_s2 = inlined_call_operand.vmem [shape: f32[2,1,1,8], index: 2, kind: input, shape index: {}]   ;;  %s1274_s3 = inlined_call_operand.vmem [shape: f32[8,96], index: 3, kind: input, shape index: {}]   ;;  %s1275_s4 = inlined_call_operand.vmem [shape: f32[1,32], index: 4, kind: input, shape index: {}]   ;;  %s1276_s5 = inlined_call_operand.hbm [shape: f32[2,16,32], index: 5, kind: output, shape index: {}]  }
   0x1   :  { %12 = vsyncpa [#allocation4 + $0x1], 0  ;;  %s1142_s18 = smov 0   ;;  %s1144_s19 = smov 0  }
   0x2   :  { %s1146_s20 = smov 0   ;;  %s1148_s21 = smov 0  }
   0x3   :  { %s1150_s22 = smov 0   ;;  %s1152_s23 = smov 0  }
   0x4 LB: > { %s953_s24 = sadd.s32 4294967295, %s1106_s23   ;;  %s954_s25 = sadd.s32 4294967294, %s1106_s23   ;;  %s1106_s23 = sphi %s1152_s23, %s18_s23   ;;  %s1102_s22 = sphi %s1150_s22, %s1283_s22   ;;  %s1098_s21 = sphi %s1148_s21, %s1282_s21   ;;  %s1094_s20 = sphi %s1146_s20, %s1281_s20   ;;  %s1090_s19 = sphi %s1144_s19, %s1280_s19   ;;  %s1086_s18 = sphi %s1142_s18, %s1279_s18  }
   0x5   : > { %s30_s26 = sadd.s32 1, %s1102_s22  ;;  %s165_s27 = sadd.s32 1, %s1094_s20 }
   0x6   : > { %p32_p0 = scmp.ge.s32.totalorder %s30_s26, 2  ;;  %p175_p1 = scmp.ne.s32.totalorder %s1094_s20, %s1090_s19 }
   0x7   : > { %p176_p2 = scmp.eq.s32.totalorder %s953_s24, 1  ;;  %p181_p3 = scmp.ne.s32.totalorder %s1090_s19, %s1086_s18 }
   0x8   : > { %s1285_s26 = smov (%p32_p0, %s30_s26), 0  ;;  %p182_p5 = scmp.eq.s32.totalorder %s954_s25, 1 }
   0x9   : > { %p1182_p4 = por %p176_p2, %p175_p1  ;;  %s160_s29 = ssub.s32 %s1102_s22, %s1285_s26 }
   0xa   : > { %p957_p6 = scmp.ge.s32.totalorder %s1106_s23, 1  ;;  %p163_p7 = scmp.eq.s32.totalorder %s160_s29, 0 }
   0xb   : > { %p1189_p8 = por %p182_p5, %p181_p3  ;;  %p237_p9 = scmp.lt.s32.totalorder %s1106_s23, 3 }
   0xc   : > { %s1195_s6 = scalar_select %p163_p7, %s1094_s20, %s165_s27  }
   0xd   : > { %p238_p10 = pnand %p957_p6, %p237_p9 }
   0xe   : > { %p282_p11 = scmp.lt.s32.totalorder (!%p238_p10), %s1098_s21, 1  ;;  %s1108_s27 = smov (!%p238_p10), 96  }
   0xf   : > { %241 = sbr.rel (%p238_p10) target bundleno = 340 (0x154), region = 40  ;;  %s1109_s29 = smov (!%p238_p10), 64  }
  0x10   : > { %s278_s7 = sand.u32 (!%p238_p10), 1, %s1090_s19   ;;  %s1048_s8 = scalar_lea.hbm (!%p238_p10), %s1276_s5, 32 }
  0x11   : > { %s958_s10 = sshll.u32 (!%p238_p10), %s278_s7, 4  ;;  %s833_s24 = scalar_lea.sflag (!%p238_p10), [#allocation4], %s278_s7 }
  0x12   : > { %s280_s11 = scalar_lea.vmem (!%p238_p10), [#allocation3], %s958_s10 }
  0x14   : > { %v306_v0 = vld [vmem:[%s1274_s3] sm:$0xff]  ;;  %s1202_s9 = scalar_select %p282_p11, %s1098_s21, 1  ;;  %vm308_vm0 = vcmask 64512   ;;  %vm458_vm1 = vcmask 778240   ;;  %vm643_vm2 = vcmask 785408   ;;  %vm829_vm3 = vcmask 261120  }
  0x15   : > { %v327_v1 = vand.u32 4294901760, %v306_v0 }
  0x16   : > { %s296_s12 = scalar_lea.vmem %s1272_s1, %s1202_s9  ;;  %s966_s13 = sshll.u32 %s1202_s9, 4 }
  0x17   : > { %v1204_v2 = vsub.f32 %v306_v0, %v327_v1  ;;  %404 = vmatpush.msra.mxu3 %v327_v1  ;;  %328 = vmatpush.msra.mxu0 %v327_v1  ;;  %v307_v3 = vld [vmem:[%s296_s12] sm:$0x1]  ;;  %s289_s16 = scalar_lea.vmem %s1271_s0, %s966_s13  ;;  %s302_s25 = scalar_lea.vmem %s1273_s2, %s1202_s9 }
  0x18   : > { %v310_v5 = vsel %vm308_vm0, %v307_v3, 0  ;;  %v304_v8 = vld [vmem:[%s289_s16] sm:$0xff]  ;;  %v305_v9 = vld [vmem:[%s289_s16 + $0x8] sm:$0xff]  ;;  %s967_s12 = sshll.u32 %s1098_s21, 4  ;;  %s847_s16 = sshll.u32 %s280_s11, 4  ;;  %s848_s16 = int_to_ptr.vmem [resolvable:$true] %s847_s16 }
  0x19   : > { %381 = vmatpush.msra.mxu2 %v1204_v2  ;;  %v355_v4 = vand.u32 4294901760, %v1204_v2  ;;  %v329_v6 = vand.u32 4294901760, %v310_v5  ;;  %v461_v10 = vsel %vm308_vm0, %v304_v8, 0  ;;  %v464_v11 = vsel %vm308_vm0, %v305_v9, 0  ;;  %v646_v26 = vld [vmem:[%s302_s25] sm:$0x1]  ;;  %s846_s15 = scalar_lea.hbm %s1276_s5, %s967_s12 }
  0x1a   : > { %v483_v14 = vand.u32 4294901760, %v461_v10  ;;  %v491_v15 = vand.u32 4294901760, %v464_v11  ;;  %v648_v28 = vsel %vm308_vm0, %v646_v26, 0  ;;  %s849_s17 = sshll.u32 %s846_s15, 4  ;;  %s850_s17 = int_to_ptr.hbm [resolvable:$true] %s849_s17 }
  0x1b   : > { %482 = vmatpush.msrb.mxu2 %v327_v1  ;;  %v356_v7 = vsub.f32 %v1204_v2, %v355_v4  ;;  %430 = vmatpush.msrb.mxu0 %v355_v4  ;;  %v330_v12 = vsub.f32 %v310_v5, %v329_v6  ;;  %v667_v29 = vand.u32 4294901760, %v648_v28  ;;  %s1042_s25 = sshra.s32 %s850_s17, 4  ;;  %s1043_s25 = int_to_ptr.hbm [resolvable:$true] %s1042_s25 }
  0x1c   : > { %v484_v17 = vsub.f32 %v461_v10, %v483_v14  ;;  %v492_v18 = vsub.f32 %v464_v11, %v491_v15  ;;  %s1044_s21 = scalar_lea.hbm %s1043_s25, 16  ;;  %p1049_p1 = scmp.lt.s32.totalorder %s1043_s25, %s1276_s5 }
  0x1d   : > { %v357_v13 = vand.u32 4294901760, %v356_v7  ;;  %384 = vmatmul.f32.vlgmr.msra.gmra.mxu2 %v330_v12  ;;  %v331_v16 = vand.u32 4294901760, %v330_v12  ;;  %v668_v30 = vsub.f32 %v648_v28, %v667_v29  ;;  %p1045_p12 = scmp.ne.s32.totalorder %s1043_s25, %s1044_s21  ;;  %p1050_p2 = scmp.lt.s32.totalorder %s1048_s8, %s1044_s21 }
  0x1e   : > { %v485_v20 = vand.u32 4294901760, %v484_v17  ;;  %607 = vmatpush.msra.mxu2 %v355_v4  ;;  %v493_v23 = vand.u32 4294901760, %v492_v18 }
  0x1f   : > { %358 = vmatpush.msra.mxu1 %v357_v13  ;;  %520 = vmatpush.msrb.mxu3 %v357_v13  ;;  %v332_v19 = vsub.f32 %v330_v12, %v331_v16  ;;  %v669_v31 = vand.u32 4294901760, %v668_v30  ;;  %p1046_p13 = pnand %p1045_p12, %p1182_p4  ;;  %p1051_p3 = por %p1050_p2, %p1049_p1 }
  0x20   : > { %360 = vmatmul.f32.vlgmr.msra.gmra.mxu1 %v329_v6  ;;  %408 = vmatmul.f32.vlgmr.msra.gmra.mxu3 %v331_v16  ;;  %v486_v22 = vsub.f32 %v484_v17, %v485_v20  ;;  %v494_v25 = vsub.f32 %v492_v18, %v493_v23 }
  0x21   : > { %452 = vmatpush.msrb.mxu1 %v327_v1  ;;  %633 = vmatpush.msra.mxu3 %v327_v1  ;;  %v333_v21 = vand.u32 4294901760, %v332_v19  ;;  %v670_v32 = vsub.f32 %v668_v30, %v669_v31  ;;  %p1047_p0 = pneg %p1046_p13 }
  0x22   : > { %v487_v24 = vand.u32 4294901760, %v486_v22  ;;  %v495_v27 = vand.u32 4294901760, %v494_v25 }
  0x23   : > { %575 = vmatpush.msra.mxu1 %v327_v1  ;;  %334 = vmatmul.f32.vlgmr.msra.gmra.mxu0 %v333_v21  ;;  %v671_v33 = vand.u32 4294901760, %v670_v32  ;;  %v1027_v21 = vld [vmem:[%s1275_s4] ss:$0 sm:$0xff]  ;;  %p1052_p5 = pnand %p1051_p3, %p1047_p0 }
  0x24   : > { %547 = vmatpush.msra.mxu0 %v1204_v2 }
  0x25   : > { %488 = vmatmul.f32.vlgmr.msrb.gmra.mxu2 %v487_v24 }
  0x26   : > { %768 = vmatpush.msrb.mxu2 %v355_v4 }
  0x28   : > { %454 = vmatmul.f32.vlgmr.msrb.gmra.mxu1 %v329_v6  ;;  %522 = vmatmul.f32.vlgmr.msrb.gmra.mxu3 %v483_v14 }
  0x29   : > { %696 = vmatpush.msrb.mxu1 %v357_v13  ;;  %790 = vmatpush.msrb.mxu3 %v327_v1 }
  0x2b   : > { %432 = vmatmul.f32.vlgmr.msrb.gmra.mxu0 %v329_v6 }
  0x2c   : > { %666 = vmatpush.msrb.mxu0 %v327_v1 }
  0x2d   : > { %496 = vmatmul.f32.gmra.mxu2 %v495_v27 }
  0x30   : > { %579 = vmatmul.f32.vlgmr.msra.gmra.mxu1 %v485_v20  ;;  %526 = vmatmul.f32.gmra.mxu3 %v491_v15 }
  0x31   : > { %742 = vmatpush.msra.mxu1 %v327_v1 }
  0x33   : > { %550 = vmatmul.f32.vlgmr.msra.gmra.mxu0 %v484_v17 }
  0x34   : > { %719 = vmatpush.msra.mxu0 %v1204_v2 }
  0x35   : > { %609 = vmatmul.f32.vlgmr.msra.gmra.mxu2 %v483_v14 }
  0x38   : > { %585 = vmatmul.f32.gmra.mxu1 %v493_v23  ;;  %635 = vmatmul.f32.vlgmr.msra.gmra.mxu3 %v483_v14 }
  0x3b   : > { %555 = vmatmul.f32.gmra.mxu0 %v492_v18 }
  0x3d   : > { %613 = vmatmul.f32.gmra.mxu2 %v491_v15 }
  0x40   : > { %698 = vmatmul.f32.vlgmr.msrb.gmra.mxu1 %v667_v29  ;;  %639 = vmatmul.f32.gmra.mxu3 %v491_v15 }
  0x43   : > { %672 = vmatmul.f32.vlgmr.msrb.gmra.mxu0 %v671_v33 }
  0x45   : > { %770 = vmatmul.f32.vlgmr.msrb.gmra.mxu2 %v667_v29 }
  0x48   : > { %746 = vmatmul.f32.vlgmr.msra.gmra.mxu1 %v669_v31  ;;  %792 = vmatmul.f32.vlgmr.msrb.gmra.mxu3 %v667_v29 }
  0x4b   : > { %722 = vmatmul.f32.vlgmr.msra.gmra.mxu0 %v668_v30 }
  0x9d   : > { %v361_v34 = vpop.f32.mrf.mxu1 }
  0xa0   : > { %v335_v35 = vpop.f32.mrf.mxu0  ;;  %v385_v36 = vpop.f32.mrf.mxu2 }
  0xa1   : > { %v362_v37 = vadd.f32 %v361_v34, %v335_v35 }
  0xa3   : > { %v409_v38 = vpop.f32.mrf.mxu3  ;;  %v386_v39 = vadd.f32 %v385_v36, %v362_v37 }
  0xa5   : > { %v455_v40 = vpop.f32.mrf.mxu1  ;;  %v410_v41 = vadd.f32 %v409_v38, %v386_v39 }
  0xa8   : > { %v433_v42 = vpop.f32.mrf.mxu0  ;;  %v489_v43 = vpop.f32.mrf.mxu2 }
  0xa9   : > { %v434_v44 = vadd.f32 %v433_v42, %v410_v41 }
  0xab   : > { %v523_v45 = vpop.f32.mrf.mxu3  ;;  %v456_v46 = vadd.f32 %v455_v40, %v434_v44 }
  0xac   : > { %v524_v50 = vadd.f32 %v523_v45, %v489_v43 }
  0xad   : > { %v580_v47 = vpop.f32.mrf.mxu1  ;;  %459 = vst.msk [vmem:[#allocation2] sm:$0x1] %vm458_vm1, %v456_v46 }
  0xb0   : > { %v497_v48 = vpop.f32.mrf.mxu2  ;;  %v551_v49 = vpop.f32.mrf.mxu0 }
  0xb1   : > { %v552_v52 = vadd.f32 %v551_v49, %v524_v50 }
  0xb3   : > { %v527_v51 = vpop.f32.mrf.mxu3  ;;  %v581_v54 = vadd.f32 %v580_v47, %v552_v52 }
  0xb4   : > { %v528_v57 = vadd.f32 %v527_v51, %v497_v48 }
  0xb5   : > { %v586_v53 = vpop.f32.mrf.mxu1 }
  0xb8   : > { %v556_v55 = vpop.f32.mrf.mxu0  ;;  %v610_v56 = vpop.f32.mrf.mxu2 }
  0xb9   : > { %v611_v58 = vadd.f32 %v610_v56, %v581_v54  ;;  %v557_v60 = vadd.f32 %v556_v55, %v528_v57 }
  0xbb   : > { %v636_v59 = vpop.f32.mrf.mxu3  ;;  %v587_v62 = vadd.f32 %v586_v53, %v557_v60 }
  0xbc   : > { %v637_v61 = vadd.f32 %v636_v59, %v611_v58 }
  0xbd   : > { %v699_v63 = vpop.f32.mrf.mxu1 }
  0xbe   : > { %644 = vst.msk [vmem:[#allocation2 + $0x1] sm:$0xff] %vm643_vm2, %v637_v61 }
  0xc0   : > { %v614_v0 = vpop.f32.mrf.mxu2  ;;  %v673_v1 = vpop.f32.mrf.mxu0 }
  0xc1   : > { %v615_v2 = vadd.f32 %v614_v0, %v587_v62  ;;  %v700_v6 = vadd.f32 %v699_v63, %v673_v1 }
  0xc3   : > { %v640_v3 = vpop.f32.mrf.mxu3 }
  0xc4   : > { %v641_v4 = vadd.f32 %v640_v3, %v615_v2 }
  0xc5   : > { %v799_v5 = vld [vmem:[#allocation2 + $0x1] sm:$0xff]  ;;  %v747_v8 = vpop.f32.mrf.mxu1 }
  0xc6   : > { %645 = vst.msk [vmem:[#allocation2 + $0x9] sm:$0xff] %vm643_vm2, %v641_v4  ;;  %803 = vrot.lane.b32.xlu0 %v799_v5, %s1108_s27  ;;  %v797_v19 = vld [vmem:[#allocation2] sm:$0xff] }
  0xc8   : > { %v723_v7 = vpop.f32.mrf.mxu0  ;;  %v771_v10 = vpop.f32.mrf.mxu2 }
  0xc9   : > { %v724_v9 = vadd.f32 %v723_v7, %v700_v6 }
  0xcb   : > { %v748_v11 = vadd.f32 %v747_v8, %v724_v9  ;;  %v793_v14 = vpop.f32.mrf.mxu3 }
  0xcd   : > { %v811_v12 = vld [vmem:[#allocation2 + $0x2] sm:$0xff]  ;;  %v772_v15 = vadd.f32 %v771_v10, %v748_v11 }
  0xce   : > { %v800_v13 = vld [vmem:[#allocation2 + $0x9] sm:$0xff]  ;;  %815 = vrot.lane.b32.xlu1 %v811_v12, %s1109_s29 }
  0xcf   : > { %805 = vrot.lane.b32.xlu0 %v800_v13, %s1108_s27  ;;  %v794_v16 = vadd.f32 %v793_v14, %v772_v15  ;;  %v798_v26 = vld [vmem:[#allocation2 + $0x8] sm:$0xff] }
  0xd1   : > { %796 = vst.msk [vmem:[#allocation2 + $0x11] sm:$0x1] %vm458_vm1, %v794_v16 }
  0xd8   : > { %v812_v17 = vld [vmem:[#allocation2 + $0xa] sm:$0xff] }
  0xd9   : > { %817 = vrot.lane.b32.xlu1 %v812_v17, %s1109_s29 }
 0x138   : > { %v804_v18 = vpop.permute.xlu0 %803 }
 0x139   : > { %v809_v20 = vadd.f32 %v804_v18, %v797_v19 }
 0x140   : > { %v816_v22 = vpop.permute.xlu1 %815 }
 0x141   : > { %v821_v23 = vadd.f32 %v816_v22, %v809_v20  ;;  %v806_v25 = vpop.permute.xlu0 %805 }
 0x142   : > { %v810_v27 = vadd.f32 %v806_v25, %v798_v26 }
 0x143   : > { %v827_v24 = vadd.f32 %v1027_v21, %v821_v23 }
 0x145   : > { %830 = vst.msk [vmem:[%s280_s11] sm:$0xff] %vm829_vm3, %v827_v24 }
 0x14b   : > { %v818_v28 = vpop.permute.xlu1 %817 }
 0x14c   : > { %v822_v29 = vadd.f32 %v818_v28, %v810_v27 }
 0x14e   : > { %v828_v30 = vadd.f32 %v1027_v21, %v822_v29 }
 0x150   : > { %831 = vst.msk [vmem:[%s280_s11 + $0x8] sm:$0xff] %vm829_vm3, %v828_v30 }
 0x151   : > { %1055 = shalt.err (!%p1052_p5)
}
 0x152   : > { %s1110_s7 = smov 128   ;;  %s1111_s11 = smov 8  }
 0x153   : > { %968 = dma.vmem_to_hbm [thread:$0]  (%p1182_p4), %s848_s16, 256, %s850_s17, %s833_s24, %s1110_s7, %s1110_s7, %s1111_s11  }
 0x154 PF: > { %p974_p6 = scmp.ge.s32.totalorder %s1106_s23, 2  ;;  %s864_s12 = sand.u32 1, %s1086_s18  }
 0x155   : > { %s865_s13 = scalar_lea.sflag [#allocation4], %s864_s12 }
 0x156   : > { %p971_p7 = pnand %p974_p6, %p1189_p8 }
 0x158   : > { %p972_p9 = pneg %p971_p7 }
 0x15a   : > { %1081 = dma.done.wait (%p972_p9), %s865_s13, 256  }
 0x15b   : > { %1083 = vsyncadd (%p972_p9), %s865_s13, 4294967040  ;;  %s18_s23 = sadd.s32 1, %s1106_s23   ;;  %s1279_s18 = smov %s1090_s19 }
 0x15c   : > { %p15_p10 = scmp.ge.s32.totalorder %s18_s23, 4   ;;  %s1280_s19 = smov %s1094_s20 }
 0x15d   : > { %s1281_s20 = smov %s1195_s6  ;;  %s1282_s21 = smov %s1102_s22 }
 0x15e   : > { %s1283_s22 = smov %s1285_s26  ;;  %17 = sbr.rel (!%p15_p10) target bundleno = 4 (0x4), region = 81 }
 0x163   :  { %871 = vsyncpa [#allocation4], 1 }
 0x164   :  { %873 = vsyncpa [#allocation4 + $0x1], 1 }

</bundles_post_ra>
